<compile_context>
chip_gen: v6e
topology: v6e:2x2x1
jax: 0.10.0
libtpu: 0.0.40
codegen_flags: <defaults>
</compile_context>

<pallas_src>
import functools
import math

import jax
import jax.numpy as jnp
from jax.experimental import pallas as pl
from jax.experimental.pallas import tpu as pltpu

LANE = 128
SUBLANE = 8


def _round_up(x, m):
    return ((x + m - 1) // m) * m


def mlp_kernel(x_ref, w1_ref, w2_ref, w3_ref, b_ref, out_ref, *, h_pad, c):
    """One batch tile: x @ W1 -> ReLU -> @ W2 -> ReLU -> @ W3 (+ biases)."""
    bias = b_ref[...]                      # (8, >=h_pad); rows 0..2 used
    b1 = bias[0:1, :h_pad]
    b2 = bias[1:2, :h_pad]
    b3 = bias[2:3, :c]

    wdt = w1_ref.dtype
    # Cast activations to the weight dtype so every matmul is a native (bf16)
    # MXU op with f32 accumulation.
    x = x_ref[...].astype(wdt)

    # Layer 1: Linear(input -> hidden) + ReLU
    h = jnp.dot(x, w1_ref[...], preferred_element_type=jnp.float32) + b1
    h = jnp.maximum(h, 0.0)
    # Layer 2: Linear(hidden -> hidden) + ReLU   (num_hidden_layers - 1 == 1)
    h = jnp.dot(h.astype(wdt), w2_ref[...],
                preferred_element_type=jnp.float32) + b2
    h = jnp.maximum(h, 0.0)
    # Output head: Linear(hidden -> num_classes), no activation.
    out_ref[...] = (jnp.dot(h.astype(wdt), w3_ref[...],
                            preferred_element_type=jnp.float32) + b3
                    ).astype(out_ref.dtype)


def init_params(key, input_size, hidden_size, num_classes, dtype=jnp.bfloat16):
    """nn.Linear-style init: U(-1/sqrt(fan_in), 1/sqrt(fan_in)); weights (in, out)."""
    keys = jax.random.split(key, 6)

    def linear(kw, kb, fan_in, fan_out):
        bound = 1.0 / math.sqrt(fan_in)
        w = jax.random.uniform(kw, (fan_in, fan_out), jnp.float32, -bound, bound)
        b = jax.random.uniform(kb, (1, fan_out), jnp.float32, -bound, bound)
        return w.astype(dtype), b.astype(dtype)

    w1, b1 = linear(keys[0], keys[1], input_size, hidden_size)
    w2, b2 = linear(keys[2], keys[3], hidden_size, hidden_size)
    w3, b3 = linear(keys[4], keys[5], hidden_size, num_classes)
    return {"w1": w1, "b1": b1, "w2": w2, "b2": b2, "w3": w3, "b3": b3}


def pad_params(params):
    """One-time pad of the *hidden* dim only to a lane multiple; pack biases.

    W1 keeps its unpadded row count (feature dim stays as-is) and W3 keeps its
    unpadded column count (num_classes stays narrow).  Zero padding of the
    hidden dim is math-preserving (padded units compute to exactly 0).
    """
    w1, b1 = params["w1"], params["b1"]
    w2, b2 = params["w2"], params["b2"]
    w3, b3 = params["w3"], params["b3"]
    f, h = w1.shape
    c = w3.shape[1]
    h_pad = _round_up(h, LANE)
    w_bias = max(h_pad, _round_up(c, LANE))

    w1_p = jnp.pad(w1, ((0, 0), (0, h_pad - h)))            # (f, h_pad)
    w2_p = jnp.pad(w2, ((0, h_pad - h), (0, h_pad - h)))    # (h_pad, h_pad)
    w3_p = jnp.pad(w3, ((0, h_pad - h), (0, 0)))            # (h_pad, c)

    b_pack = jnp.zeros((SUBLANE, w_bias), dtype=w1.dtype)
    b_pack = b_pack.at[0, :h].set(b1[0])
    b_pack = b_pack.at[1, :h].set(b2[0])
    b_pack = b_pack.at[2, :c].set(b3[0])

    meta = {"f": f, "h": h, "c": c, "h_pad": h_pad}
    return {"w1": w1_p, "w2": w2_p, "w3": w3_p, "b_pack": b_pack, "meta": meta}


def _choose_batch_tile(batch, block_b):
    """Pick a batch tile: multiple of 8 (or == batch), >=2 grid steps when possible."""
    if batch <= SUBLANE:
        return batch                       # single full-dim block
    tb = min(block_b, _round_up(batch, SUBLANE))
    if pl.cdiv(batch, tb) < 2:
        # Split so v7x's two TensorCores both get work (no-op on v5e/v6e).
        tb = _round_up(pl.cdiv(batch, 2), SUBLANE)
    return tb


def simple_classifier_forward(x, padded_params, *, block_b=1024):
    """x: (B, input_size). padded_params: output of pad_params()."""
    meta = padded_params["meta"]
    f, c, h_pad = meta["f"], meta["c"], meta["h_pad"]
    w1, w2, w3, b_pack = (padded_params["w1"], padded_params["w2"],
                          padded_params["w3"], padded_params["b_pack"])

    B = x.shape[0]
    assert x.shape[1] == f, "feature dim mismatch"

    tb = _choose_batch_tile(B, block_b)
    grid = (pl.cdiv(B, tb),)               # last block (if any) is masked by Pallas

    kernel = functools.partial(mlp_kernel, h_pad=h_pad, c=c)

    flops = 2 * B * (f * h_pad + h_pad * h_pad + h_pad * c)
    bytes_accessed = (x.dtype.itemsize * B * f            # x read (unpadded)
                      + 4 * B * c                          # f32 logits write (narrow)
                      + w1.dtype.itemsize * (w1.size + w2.size + w3.size + b_pack.size))

    out = pl.pallas_call(
        kernel,
        out_shape=jax.ShapeDtypeStruct((B, c), jnp.float32),
        grid=grid,
        in_specs=[
            pl.BlockSpec((tb, f), lambda i: (i, 0)),        # x: tiled over batch, unpadded f
            pl.BlockSpec((f, h_pad), lambda i: (0, 0)),     # W1: resident
            pl.BlockSpec((h_pad, h_pad), lambda i: (0, 0)),  # W2: resident
            pl.BlockSpec((h_pad, c), lambda i: (0, 0)),     # W3: resident, narrow cols
            pl.BlockSpec(b_pack.shape, lambda i: (0, 0)),   # packed biases: resident
        ],
        out_specs=pl.BlockSpec((tb, c), lambda i: (i, 0)),  # narrow (B, num_classes) output
        compiler_params=pltpu.CompilerParams(
            dimension_semantics=("parallel",)),
        cost_estimate=pl.CostEstimate(
            flops=int(flops), transcendentals=0, bytes_accessed=int(bytes_accessed)),
    )(x, w1, w2, w3, b_pack)

    return out


if __name__ == "__main__":
    # Shapes implied by the reference script: hidden_size=16, num_hidden_layers=2.
    # Synthetic input_size / num_classes / batch chosen small.
    batch = 8
    input_size = 32
    hidden_size = 16
    num_classes = 4

    key = jax.random.PRNGKey(0)
    kx, kp = jax.random.split(key)
    x = jax.random.normal(kx, (batch, input_size), dtype=jnp.float32)

    params = init_params(kp, input_size, hidden_size, num_classes,
                         dtype=jnp.bfloat16)          # bf16 weights (MXU-native)
    padded = pad_params(params)                        # one-time hidden-dim pad / bias pack

    out = simple_classifier_forward(x, padded)
    jax.block_until_ready(out)

    # Pure-JAX reference of the same math (unpadded bf16 params, f32 accumulate).
    wdt = params["w1"].dtype
    xb = x.astype(wdt)
    h = jnp.maximum(jnp.dot(xb, params["w1"],
                            preferred_element_type=jnp.float32) + params["b1"], 0.0)
    h = jnp.maximum(jnp.dot(h.astype(wdt), params["w2"],
                            preferred_element_type=jnp.float32) + params["b2"], 0.0)
    ref = jnp.dot(h.astype(wdt), params["w3"],
                  preferred_element_type=jnp.float32) + params["b3"]

    assert out.shape == (batch, num_classes)
    assert jnp.allclose(out, ref, atol=2e-2, rtol=2e-2)

    print("KERNEL_OK")
</pallas_src>

<mosaic_0001>
module attributes {stable_mosaic.version = 11 : i64} {
  func.func @mlp_kernel(%arg0: i32, %arg1: memref<8x32xf32, #tpu.memory_space<vmem>>, %arg2: memref<32x128xbf16, #tpu.memory_space<vmem>>, %arg3: memref<128x128xbf16, #tpu.memory_space<vmem>>, %arg4: memref<128x4xbf16, #tpu.memory_space<vmem>>, %arg5: memref<8x128xbf16, #tpu.memory_space<vmem>>, %arg6: memref<8x4xf32, #tpu.memory_space<vmem>>) attributes {dimension_semantics = [#tpu.dimension_semantics<parallel>], iteration_bounds = array<i64: 1>, scalar_prefetch = 0 : i64, scratch_operands = 0 : i64, tpu.core_type = #tpu.core_type<tc>, window_params = [{transform_indices = @transform_0, window_bounds = array<i64: 8, 32>}, {pipeline_mode = #tpu.pipeline_mode<synchronous>, transform_indices = @transform_1, window_bounds = array<i64: 32, 128>}, {pipeline_mode = #tpu.pipeline_mode<synchronous>, transform_indices = @transform_2, window_bounds = array<i64: 128, 128>}, {pipeline_mode = #tpu.pipeline_mode<synchronous>, transform_indices = @transform_3, window_bounds = array<i64: 128, 4>}, {pipeline_mode = #tpu.pipeline_mode<synchronous>, transform_indices = @transform_4, window_bounds = array<i64: 8, 128>}, {transform_indices = @transform_5, window_bounds = array<i64: 8, 4>}]} {
    %c0 = arith.constant 0 : index
    %c0_0 = arith.constant 0 : index
    %0 = vector.load %arg5[%c0, %c0_0] : memref<8x128xbf16, #tpu.memory_space<vmem>>, vector<8x128xbf16>
    %1 = vector.extract_strided_slice %0 {offsets = [0, 0], sizes = [1, 128], strides = [1, 1]} : vector<8x128xbf16> to vector<1x128xbf16>
    %2 = vector.extract_strided_slice %0 {offsets = [1, 0], sizes = [1, 128], strides = [1, 1]} : vector<8x128xbf16> to vector<1x128xbf16>
    %3 = vector.extract_strided_slice %0 {offsets = [2, 0], sizes = [1, 4], strides = [1, 1]} : vector<8x128xbf16> to vector<1x4xbf16>
    %c0_1 = arith.constant 0 : index
    %c0_2 = arith.constant 0 : index
    %4 = vector.load %arg1[%c0_1, %c0_2] : memref<8x32xf32, #tpu.memory_space<vmem>>, vector<8x32xf32>
    %5 = arith.truncf %4 : vector<8x32xf32> to vector<8x32xbf16>
    %c0_3 = arith.constant 0 : index
    %c0_4 = arith.constant 0 : index
    %6 = vector.load %arg2[%c0_3, %c0_4] : memref<32x128xbf16, #tpu.memory_space<vmem>>, vector<32x128xbf16>
    %cst = arith.constant dense<0.000000e+00> : vector<8x128xf32>
    %7 = tpu.matmul %5, %6, %cst {dimension_numbers = #tpu.dot_dimension_numbers<[1], [0], [0], [1], [0, 0, 1, 1], [], []>} : vector<8x32xbf16>, vector<32x128xbf16>, vector<8x128xf32> -> vector<8x128xf32>
    %8 = arith.extf %1 : vector<1x128xbf16> to vector<1x128xf32>
    %9 = vector.broadcast %8 : vector<1x128xf32> to vector<8x128xf32>
    %10 = arith.addf %7, %9 : vector<8x128xf32>
    %cst_5 = arith.constant 0.000000e+00 : f32
    %11 = vector.broadcast %cst_5 : f32 to vector<8x128xf32>
    %12 = arith.maximumf %10, %11 : vector<8x128xf32>
    %13 = arith.truncf %12 : vector<8x128xf32> to vector<8x128xbf16>
    %c0_6 = arith.constant 0 : index
    %c0_7 = arith.constant 0 : index
    %14 = vector.load %arg3[%c0_6, %c0_7] : memref<128x128xbf16, #tpu.memory_space<vmem>>, vector<128x128xbf16>
    %cst_8 = arith.constant dense<0.000000e+00> : vector<8x128xf32>
    %15 = tpu.matmul %13, %14, %cst_8 {dimension_numbers = #tpu.dot_dimension_numbers<[1], [0], [0], [1], [0, 0, 1, 1], [], []>} : vector<8x128xbf16>, vector<128x128xbf16>, vector<8x128xf32> -> vector<8x128xf32>
    %16 = arith.extf %2 : vector<1x128xbf16> to vector<1x128xf32>
    %17 = vector.broadcast %16 : vector<1x128xf32> to vector<8x128xf32>
    %18 = arith.addf %15, %17 : vector<8x128xf32>
    %cst_9 = arith.constant 0.000000e+00 : f32
    %19 = vector.broadcast %cst_9 : f32 to vector<8x128xf32>
    %20 = arith.maximumf %18, %19 : vector<8x128xf32>
    %21 = arith.truncf %20 : vector<8x128xf32> to vector<8x128xbf16>
    %c0_10 = arith.constant 0 : index
    %c0_11 = arith.constant 0 : index
    %22 = vector.load %arg4[%c0_10, %c0_11] : memref<128x4xbf16, #tpu.memory_space<vmem>>, vector<128x4xbf16>
    %cst_12 = arith.constant dense<0.000000e+00> : vector<8x4xf32>
    %23 = tpu.matmul %21, %22, %cst_12 {dimension_numbers = #tpu.dot_dimension_numbers<[1], [0], [0], [1], [0, 0, 1, 1], [], []>} : vector<8x128xbf16>, vector<128x4xbf16>, vector<8x4xf32> -> vector<8x4xf32>
    %24 = arith.extf %3 : vector<1x4xbf16> to vector<1x4xf32>
    %25 = vector.broadcast %24 : vector<1x4xf32> to vector<8x4xf32>
    %26 = arith.addf %23, %25 : vector<8x4xf32>
    %c0_13 = arith.constant 0 : index
    %c0_14 = arith.constant 0 : index
    %27 = vector.load %arg6[%c0_13, %c0_14] : memref<8x4xf32, #tpu.memory_space<vmem>>, vector<8x4xf32>
    tpu.vector_store %arg6[%c0_13, %c0_14], %26 {strides = array<i32>} : memref<8x4xf32, #tpu.memory_space<vmem>>, vector<8x4xf32>,
    return
  }
  func.func @transform_0(%arg0: i32) -> (i32, i32) {
    %c0_i32 = arith.constant 0 : i32
    %c0_i32_0 = arith.constant 0 : i32
    return %arg0, %c0_i32 : i32, i32
  }
  func.func @transform_1(%arg0: i32) -> (i32, i32) {
    %c0_i32 = arith.constant 0 : i32
    %c0_i32_0 = arith.constant 0 : i32
    %c0_i32_1 = arith.constant 0 : i32
    return %c0_i32, %c0_i32_0 : i32, i32
  }
  func.func @transform_2(%arg0: i32) -> (i32, i32) {
    %c0_i32 = arith.constant 0 : i32
    %c0_i32_0 = arith.constant 0 : i32
    %c0_i32_1 = arith.constant 0 : i32
    return %c0_i32, %c0_i32_0 : i32, i32
  }
  func.func @transform_3(%arg0: i32) -> (i32, i32) {
    %c0_i32 = arith.constant 0 : i32
    %c0_i32_0 = arith.constant 0 : i32
    %c0_i32_1 = arith.constant 0 : i32
    return %c0_i32, %c0_i32_0 : i32, i32
  }
  func.func @transform_4(%arg0: i32) -> (i32, i32) {
    %c0_i32 = arith.constant 0 : i32
    %c0_i32_0 = arith.constant 0 : i32
    %c0_i32_1 = arith.constant 0 : i32
    return %c0_i32, %c0_i32_0 : i32, i32
  }
  func.func @transform_5(%arg0: i32) -> (i32, i32) {
    %c0_i32 = arith.constant 0 : i32
    %c0_i32_0 = arith.constant 0 : i32
    return %arg0, %c0_i32 : i32, i32
  }
}

</mosaic_0001>

<bundles_post_ra>
// kernel: tpu_custom_call.1
= control target key start
LH: loop header
LB: loop body
LE: loop exit
PB: predicated region body
PF: predicated region fallthrough
CT: control target
= control target key end

     0   :  { %10 = vsyncpa [#allocation3], 0  ;;  %s619_s0 = inlined_call_operand.hbm [shape: f32[8,32], index: 0, kind: input, shape index: {}]   ;;  %s620_s1 = inlined_call_operand.hbm [shape: bf16[32,128], index: 1, kind: input, shape index: {}]   ;;  %s621_s2 = inlined_call_operand.vmem [shape: bf16[128,128], index: 2, kind: input, shape index: {}]   ;;  %s622_s3 = inlined_call_operand.vmem [shape: bf16[128,4], index: 3, kind: input, shape index: {}]   ;;  %s623_s4 = inlined_call_operand.vmem [shape: bf16[8,128], index: 4, kind: input, shape index: {}]   ;;  %s624_s5 = inlined_call_operand.vmem [shape: f32[8,4], index: 5, kind: output, shape index: {}]  }
   0x1   :  { %11 = vsyncpa [#allocation5], 0  ;;  %s499_s18 = smov [#allocation2]   ;;  %s500_s20 = smov [#allocation4]  }
   0x2   :  { %s18_s19 = sshll.u32 %s499_s18, 4  ;;  %s27_s21 = sshll.u32 %s500_s20, 4  ;;  %s19_s19 = int_to_ptr.vmem [resolvable:$true] %s18_s19  ;;  %s28_s21 = int_to_ptr.vmem [resolvable:$true] %s27_s21 }
   0x3   :  { %s463_s22 = scalar_lea.vmem %s19_s19, 128  ;;  %p468_p1 = scmp.lt.s32.totalorder %s19_s19, %s19_s19 }
   0x4   :  { %p464_p0 = scmp.ne.s32.totalorder %s19_s19, %s463_s22  ;;  %p469_p2 = scmp.lt.s32.totalorder %s463_s22, %s463_s22 }
   0x6   :  { %p470_p3 = por %p469_p2, %p468_p1 }
   0x8   :  { %p471_p4 = pnand %p470_p3, %p464_p0 }
   0xa   :  { %474 = shalt.err (!%p471_p4)
}
   0xb   :  { %21 = dma.hbm_to_vmem [thread:$0]  %s619_s0, 128, %s19_s19, [#allocation3]  }
   0xc   :  { %s483_s25 = scalar_lea.vmem %s28_s21, 256  ;;  %p488_p6 = scmp.lt.s32.totalorder %s28_s21, %s28_s21 }
   0xd   :  { %p484_p5 = scmp.ne.s32.totalorder %s28_s21, %s483_s25  ;;  %p489_p7 = scmp.lt.s32.totalorder %s483_s25, %s483_s25 }
   0xf   :  { %p490_p8 = por %p489_p7, %p488_p6 }
  0x11   :  { %p491_p9 = pnand %p490_p8, %p484_p5 }
  0x13   :  { %494 = shalt.err (!%p491_p9)
}
  0x14   :  { %s501_s26 = smov 64   ;;  %s502_s27 = smov 4  }
  0x15   :  { %33 = dma.hbm_to_vmem [thread:$0]  %s620_s1, 256, %s28_s21, [#allocation5], %s501_s26, %s501_s26, %s502_s27  }
  0x16   :  { %495 = dma.done.wait [#allocation3], 128  }
  0x17   :  { %496 = vsyncadd [#allocation3], 4294967168 }
  0x18   :  { %497 = dma.done.wait [#allocation5], 256  }
  0x19   :  { %498 = vsyncadd [#allocation5], 4294967040  ;;  %v503_v0 = vmov 0.0   ;;  %vm504_vm0 = vmmov 0   ;;  %v437_v1 = vld [vmem:[#allocation4 + $0x8] sm:$0xff]   ;;  %v438_v2 = vld [vmem:[#allocation4] sm:$0xff]   ;;  %v55_v19 = vlaneseq }
  0x1a   :  { %383 = vmatprep.subr.bf16.mxu0 %v503_v0  ;;  %387 = vmatprep.mubr.msk.bf16.mxu0 %vm504_vm0, %v503_v0  ;;  %v48_v3 = vld [vmem:[#allocation2] sm:$0xff]  ;;  %v439_v4 = vld [vmem:[%s621_s2 + $0x38] sm:$0xff]   ;;  %v440_v6 = vld [vmem:[%s621_s2 + $0x30] sm:$0xff]   ;;  %vm71_vm1 = vcmask 261120   ;;  %vm335_vm2 = vcmask 31744  }
  0x1b   :  { %391 = vmatprep.subr.bf16.mxu1 %v503_v0  ;;  %407 = vmatprep.mubr.msk.bf16.mxu1 %vm504_vm0, %v503_v0  ;;  %v49_v5 = vpack.c.bf16 %v48_v3, %v48_v3  ;;  %v441_v7 = vld [vmem:[%s621_s2 + $0x28] sm:$0xff]   ;;  %v442_v8 = vld [vmem:[%s621_s2 + $0x20] sm:$0xff]   ;;  %v443_v9 = vld [vmem:[%s621_s2 + $0x18] sm:$0xff]   ;;  %v56_v20 = vshrl.u32 %v55_v19, 7 }
  0x1c   :  { %384 = vmatpush3.bf16.msra.mxu0 %v437_v1  ;;  %392 = vmatpush3.bf16.msra.mxu1 %v439_v4  ;;  %v444_v10 = vld [vmem:[%s621_s2 + $0x10] sm:$0xff]   ;;  %v445_v11 = vld [vmem:[%s621_s2 + $0x8] sm:$0xff]   ;;  %v446_v12 = vld [vmem:[%s621_s2] sm:$0xff]  }
  0x1d   :  { %385 = vmatprep.subr.bf16.mxu0 %v503_v0  ;;  %393 = vmatprep.subr.bf16.mxu1 %v503_v0  ;;  %v447_v13 = vld [vmem:[%s622_s3 + $0x38] sm:$0xff]   ;;  %v448_v14 = vld [vmem:[%s622_s3 + $0x30] sm:$0xff]   ;;  %v449_v15 = vld [vmem:[%s622_s3 + $0x28] sm:$0xff]   ;;  %v57_v23 = vsub.s32 0, %v56_v20  ;;  %v135_v34 = vsub.s32 1, %v56_v20  ;;  %v245_v43 = vsub.s32 2, %v56_v20 }
  0x1e   :  { %v450_v16 = vld [vmem:[%s622_s3 + $0x20] sm:$0xff]   ;;  %v451_v17 = vld [vmem:[%s622_s3 + $0x18] sm:$0xff]   ;;  %v452_v18 = vld [vmem:[%s622_s3 + $0x10] sm:$0xff]  }
  0x1f   :  { %v47_v21 = vld [vmem:[%s623_s4] sm:$0xf]  ;;  %v453_v32 = vld [vmem:[%s622_s3 + $0x8] sm:$0xff]  }
  0x20   :  { %386 = vmatpush3.bf16.msra.mxu0 %v438_v2  ;;  %394 = vmatpush3.bf16.msra.mxu1 %v440_v6  ;;  %v54_v22 = vunpack.c.l.bf16 %v47_v21  ;;  %v454_v33 = vld [vmem:[%s622_s3] sm:$0xff]  }
  0x21   :  { %411 = vmatprep.subr.bf16.mxu0 %v503_v0  ;;  %395 = vmatprep.subr.bf16.mxu1 %v503_v0 }
  0x22   :  { %v58_v24 = vrot.slane %v54_v22, %v57_v23  ;;  %v136_v35 = vrot.slane %v54_v22, %v135_v34  ;;  %v246_v44 = vrot.slane %v54_v22, %v245_v43 }
  0x23   :  { %388 = vmatmul.mubr.msk.bf16.vlgmr.msra.gmra.mxu0 %vm71_vm1, %v49_v5 }
  0x24   :  { %427 = vmatprep.mubr.msk.bf16.mxu0 %vm504_vm0, %v503_v0  ;;  %396 = vmatpush3.bf16.msra.mxu1 %v441_v7 }
  0x25   :  { %397 = vmatprep.subr.bf16.mxu1 %v503_v0  ;;  %412 = vmatpush3.bf16.msra.mxu0 %v447_v13 }
  0x26   :  { %413 = vmatprep.subr.bf16.mxu0 %v503_v0 }
  0x28   :  { %398 = vmatpush3.bf16.msra.mxu1 %v442_v8 }
  0x29   :  { %399 = vmatprep.subr.bf16.mxu1 %v503_v0  ;;  %414 = vmatpush3.bf16.msra.mxu0 %v448_v14 }
  0x2a   :  { %415 = vmatprep.subr.bf16.mxu0 %v503_v0 }
  0x2c   :  { %400 = vmatpush3.bf16.msra.mxu1 %v443_v9 }
  0x2d   :  { %401 = vmatprep.subr.bf16.mxu1 %v503_v0  ;;  %416 = vmatpush3.bf16.msra.mxu0 %v449_v15 }
  0x2e   :  { %417 = vmatprep.subr.bf16.mxu0 %v503_v0 }
  0x30   :  { %402 = vmatpush3.bf16.msra.mxu1 %v444_v10 }
  0x31   :  { %403 = vmatprep.subr.bf16.mxu1 %v503_v0  ;;  %418 = vmatpush3.bf16.msra.mxu0 %v450_v16 }
  0x32   :  { %419 = vmatprep.subr.bf16.mxu0 %v503_v0 }
  0x34   :  { %404 = vmatpush3.bf16.msra.mxu1 %v445_v11 }
  0x35   :  { %405 = vmatprep.subr.bf16.mxu1 %v503_v0  ;;  %420 = vmatpush3.bf16.msra.mxu0 %v451_v17 }
  0x36   :  { %421 = vmatprep.subr.bf16.mxu0 %v503_v0 }
  0x38   :  { %406 = vmatpush3.bf16.msra.mxu1 %v446_v12 }
  0x39   :  { %422 = vmatpush3.bf16.msra.mxu0 %v452_v18 }
  0x3a   :  { %423 = vmatprep.subr.bf16.mxu0 %v503_v0 }
  0x3d   :  { %424 = vmatpush3.bf16.msra.mxu0 %v453_v32 }
  0x3e   :  { %425 = vmatprep.subr.bf16.mxu0 %v503_v0 }
  0x41   :  { %426 = vmatpush3.bf16.msra.mxu0 %v454_v33 }
  0xe3   :  { %v109_v25 = vpop.f32.mrf.mxu0 }
  0xe4   :  { %v110_v26 = vadd.f32 %v109_v25, %v58_v24 }
  0xe5   :  { %v389_v27 = vpop.f32.mrf.mxu0 }
  0xe6   :  { %v115_v28 = vmax.f32 %v110_v26, 0.0 }
  0xe7   :  { %v112_v29 = vpop.f32.mrf.mxu0 }
  0xe8   :  { %v116_v30 = vpack.c.bf16 %v115_v28, %v115_v28 }
  0xe9   :  { %v390_v31 = vpop.f32.mrf.mxu0 }
  0xea   :  { %408 = vmatmul.mubr.bf16.vlgmr.msra.gmra.mxu1 %v116_v30 }
 0x1aa   :  { %v219_v36 = vpop.f32.mrf.mxu1 }
 0x1ab   :  { %v220_v37 = vadd.f32 %v219_v36, %v136_v35 }
 0x1ac   :  { %v409_v38 = vpop.f32.mrf.mxu1 }
 0x1ad   :  { %v225_v39 = vmax.f32 %v220_v37, 0.0 }
 0x1ae   :  { %v222_v40 = vpop.f32.mrf.mxu1 }
 0x1af   :  { %v226_v41 = vpack.c.bf16 %v225_v39, %v225_v39 }
 0x1b0   :  { %v410_v42 = vpop.f32.mrf.mxu1 }
 0x1b1   :  { %428 = vmatmul.mubr.bf16.vlgmr.msra.gmra.mxu0 %v226_v41 }
 0x271   :  { %v329_v45 = vpop.f32.mrf.mxu0 }
 0x272   :  { %v330_v46 = vadd.f32 %v329_v45, %v246_v44 }
 0x273   :  { %v429_v47 = vpop.f32.mrf.mxu0 }
 0x274   :  { %336 = vst.msk [vmem:[%s624_s5] sm:$0xff] %vm335_vm2, %v330_v46 }
 0x275   :  { %v332_v48 = vpop.f32.mrf.mxu0 }
 0x277   :  { %v430_v49 = vpop.f32.mrf.mxu0 }
 0x278   :  { %341 = vsyncpa [#allocation3], 1 }
 0x279   :  { %342 = vsyncpa [#allocation5], 1 }

</bundles_post_ra>
